<compile_context>
chip_gen: v7x
topology: tpu7x:2x2x1
jax: 0.10.0
libtpu: 0.0.40
codegen_flags: <defaults>
</compile_context>

<pallas_src>
import numpy as np

import jax
import jax.numpy as jnp
from jax.experimental import pallas as pl
from jax.experimental.pallas import tpu as pltpu


def _round_up(x, m):
    return ((x + m - 1) // m) * m


# -----------------------------------------------------------------------------
# Pallas kernel: fully-MXU fused (branch ++ trunk) MLP, feature-major layout
# -----------------------------------------------------------------------------
def _make_deeponet_kernel(time_future, hidden_meta, last_meta, act_dtype):
    """Kernel factory.

    Ref order:
      uxt_ref   : [K0, TILE]      streamed [u rows | x | y | 1 | 0...], compute_dtype
      w0_ref    : [H0p, K0]       per-batch layer-0 slab (bias folded in the ones col)
      wslab_ref : [R_w, Kmax]     packed constant weights (mm_dtype, pre-cast)
      bslab_ref : [R_b, 1]        packed constant biases (f32)
      out_ref   : [tf, TILE]
    Activation is tanh (module default), last layer has no activation.
    `hidden_meta` = [(row_off_w, hout_pad, hin_pad, row_off_b), ...] for layers 1..L-2.
    `last_meta`   = (r_func, r_loc, hin_last, rb_func, rb_loc, rb_out).
    """
    tf = time_future
    r_func, r_loc, hin_last, rb_func, rb_loc, rb_out = last_meta

    def kernel(uxt_ref, w0_ref, wslab_ref, bslab_ref, out_ref):
        # ---- layer 0 on the MXU; per-batch bias folded via the ones row/column ----
        z = jnp.dot(w0_ref[...], uxt_ref[...], preferred_element_type=jnp.float32)
        h = jnp.tanh(z).astype(act_dtype)                   # [H0p, TILE]

        # ---- fused block-diagonal hidden layers: one MXU matmul each ----
        for rw, hout, hin, rb in hidden_meta:
            w = wslab_ref[rw:rw + hout, :hin]               # static slice, pre-cast
            zz = (jnp.dot(w, h, preferred_element_type=jnp.float32)
                  + bslab_ref[rb:rb + hout, :])
            h = jnp.tanh(zz).astype(act_dtype)

        # ---- output layer split into branch / trunk halves (no sublane shuffle) ----
        wf = wslab_ref[r_func:r_func + tf, :hin_last]
        wl = wslab_ref[r_loc:r_loc + tf, :hin_last]
        x_func = (jnp.dot(wf, h, preferred_element_type=jnp.float32)
                  + bslab_ref[rb_func:rb_func + tf, :])
        x_loc = (jnp.dot(wl, h, preferred_element_type=jnp.float32)
                 + bslab_ref[rb_loc:rb_loc + tf, :])
        out_ref[...] = (x_func * x_loc
                        + bslab_ref[rb_out:rb_out + tf, :]).astype(out_ref.dtype)

    return kernel


# -----------------------------------------------------------------------------
# Parameter init (weights stored as [in, out], biases as [out])
# -----------------------------------------------------------------------------
def init_params(key, layer_sizes_branch, layer_sizes_trunk, time_window,
                time_future, eq_variables):
    sizes_b = [len(eq_variables) + 3 + time_window] + list(layer_sizes_branch) + [time_future]
    sizes_t = [2] + list(layer_sizes_trunk) + [time_future]

    params = {"branch": [], "trunk": []}
    for name, sizes in (("branch", sizes_b), ("trunk", sizes_t)):
        for i in range(len(sizes) - 1):
            key, kw, kb = jax.random.split(key, 3)
            w = 0.1 * jax.random.normal(kw, (sizes[i], sizes[i + 1]), jnp.float32)
            bb = 0.1 * jax.random.normal(kb, (sizes[i + 1],), jnp.float32)
            params[name].append((w, bb))
    key, kb = jax.random.split(key)
    params["b"] = 0.1 * jax.random.normal(kb, (time_future,), jnp.float32)
    return params


# -----------------------------------------------------------------------------
# Wrapper: constant folding, slab packing, pallas_call
# -----------------------------------------------------------------------------
def deeponet2d_forward(params, u, grid, dt, variables, eq_variables, time_future,
                       *, tile_rows=8192, compute_dtype=jnp.float32):
    """u: [b, time_window, nx, ny] (NCHW), grid: [b, 2, nx, ny], dt: [1].

    Returns [b, time_future, nx, ny], matching the PyTorch module.
    compute_dtype=jnp.bfloat16 keeps MXU operands AND resident activations in bf16
    (v6e / v7x path); use jnp.float32 on v5e.
    """
    b, tw, nx, ny = u.shape
    n_layers = len(params["branch"])
    if len(params["trunk"]) != n_layers:
        # TODO(synk): block-diagonal fusion assumes equal branch/trunk depth.
        raise NotImplementedError("branch and trunk nets must have the same depth")
    assert n_layers >= 2
    tf = time_future

    hb = [w.shape[1] for (w, _) in params["branch"]]   # per-layer output widths
    ht = [w.shape[1] for (w, _) in params["trunk"]]
    assert hb[-1] == tf and ht[-1] == tf

    # ---- tile selection: big lane-dense tiles, but >= 2 grid steps for v7x's 2 TCs ----
    p = nx * ny
    tile = min(_round_up(int(tile_rows), 128), _round_up(p, 128))
    if b * ((p + tile - 1) // tile) < 2 and p > 128:
        tile = _round_up((p + 1) // 2, 128)
    p_pad = _round_up(p, tile)
    n_row_tiles = p_pad // tile

    # ---- streamed input: [u rows | x | y | 1] feature-major, lane-dense, padded ----
    k0 = _round_up(tw + 3, 8)
    uxt = jnp.concatenate(
        [u.reshape(b, tw, p), grid.reshape(b, 2, p), jnp.ones((b, 1, p), u.dtype)],
        axis=1)                                                       # [b, tw+3, p]
    uxt = jnp.pad(uxt, ((0, 0), (0, k0 - (tw + 3)), (0, p_pad - p)))
    uxt = uxt.astype(compute_dtype)
    # TODO(synk): on v5e one could stream u as bf16 while computing in f32 to halve
    # input HBM bytes (keep the 2 coord rows f32); kept single-dtype for simplicity.

    # ---- per-batch constant branch features, folded into the layer-0 bias column ----
    dx = grid[:, 0, 0, 1] - grid[:, 0, 0, 0]            # [b]
    dy = grid[:, 1, 1, 0] - grid[:, 1, 0, 0]            # [b]
    # TODO(synk): dt is a single scalar broadcast to every batch (mirrors the PyTorch
    # `dt.repeat(b, ...)` for dt of shape [1]); per-batch dt would be silently dropped.
    const_cols = [dx, dy, jnp.broadcast_to(dt.reshape(-1)[:1], (b,))]
    for name in ("nu", "ax", "ay", "cx", "cy"):
        if name in eq_variables:
            const_cols.append(variables[name] / eq_variables[name])
    # TODO(synk): optional `embeddings` input of the PyTorch module not wired up.
    const_feats = jnp.stack(const_cols, axis=1).astype(jnp.float32)   # [b, n_const]

    w0b, b0b = params["branch"][0]          # [in_b, hb0], [hb0]
    w0t, b0t = params["trunk"][0]           # [2, ht0],   [ht0]
    hb0, ht0 = hb[0], ht[0]
    h0p = _round_up(hb0 + ht0, 8)
    assert w0b.shape[0] == tw + const_feats.shape[1], \
        "branch feature order must be [u(0..tw-1), dx, dy, dt, nu, ax, ay, cx, cy]"

    bias0 = const_feats @ w0b[tw:] + b0b[None, :]                     # [b, hb0]
    w0 = jnp.zeros((b, h0p, k0), jnp.float32)
    w0 = w0.at[:, :hb0, :tw].set(jnp.broadcast_to(w0b[:tw].T, (b, hb0, tw)))
    w0 = w0.at[:, hb0:hb0 + ht0, tw:tw + 2].set(jnp.broadcast_to(w0t.T, (b, ht0, 2)))
    w0 = w0.at[:, :hb0, tw + 2].set(bias0)                 # bias rides the ones row
    w0 = w0.at[:, hb0:hb0 + ht0, tw + 2].set(jnp.broadcast_to(b0t, (b, ht0)))
    w0 = w0.astype(compute_dtype)

    # ---- constant slabs: one mm_dtype weight slab + one f32 bias slab ----
    hpad = [_round_up(hb[i] + ht[i], 8) for i in range(n_layers - 1)]  # fused act widths
    kmax = max(hpad)
    tfp = _round_up(tf, 8)

    hidden_meta = []
    w_blocks, b_blocks = [], []
    rw = rb = 0
    for i in range(1, n_layers - 1):
        wib, bib = params["branch"][i]
        wit, bit = params["trunk"][i]
        blk = jnp.zeros((hpad[i], kmax), jnp.float32)
        blk = blk.at[:hb[i], :hb[i - 1]].set(wib.T)
        blk = blk.at[hb[i]:hb[i] + ht[i], hb[i - 1]:hb[i - 1] + ht[i - 1]].set(wit.T)
        bcol = jnp.zeros((hpad[i], 1), jnp.float32)
        bcol = bcol.at[:hb[i], 0].set(bib)
        bcol = bcol.at[hb[i]:hb[i] + ht[i], 0].set(bit)
        w_blocks.append(blk)
        b_blocks.append(bcol)
        hidden_meta.append((rw, hpad[i], hpad[i - 1], rb))
        rw += hpad[i]
        rb += hpad[i]

    # Output layer, split into branch (x_func) / trunk (x_loc) halves over the full
    # (zero-padded) fused K so neither operand needs a sublane shift of h.
    wlb, blb = params["branch"][-1]          # [hb[-2], tf], [tf]
    wlt, blt = params["trunk"][-1]           # [ht[-2], tf], [tf]
    hin_last = hpad[-1]
    wf_blk = jnp.zeros((tfp, kmax), jnp.float32).at[:tf, :hb[-2]].set(wlb.T)
    wl_blk = jnp.zeros((tfp, kmax), jnp.float32).at[:tf, hb[-2]:hb[-2] + ht[-2]].set(wlt.T)
    r_func, r_loc = rw, rw + tfp
    w_blocks += [wf_blk, wl_blk]

    def _padcol(v):
        return jnp.zeros((tfp, 1), jnp.float32).at[:tf, 0].set(v)

    rb_func, rb_loc, rb_out = rb, rb + tfp, rb + 2 * tfp
    b_blocks += [_padcol(blb), _padcol(blt), _padcol(params["b"])]

    wslab = jnp.concatenate(w_blocks, axis=0).astype(compute_dtype)   # [R_w, kmax]
    bslab = jnp.concatenate(b_blocks, axis=0)                         # [R_b, 1] f32

    last_meta = (r_func, r_loc, hin_last, rb_func, rb_loc, rb_out)
    kernel = _make_deeponet_kernel(tf, hidden_meta, last_meta, compute_dtype)

    def tile_map(bi, pi):
        return (bi, 0, pi)

    def batch_map(bi, pi):
        return (bi, 0, 0)

    def const_map(bi, pi):
        return (0, 0)

    out_padded = pl.pallas_call(
        kernel,
        out_shape=jax.ShapeDtypeStruct((b, tf, p_pad), jnp.float32),
        grid_spec=pltpu.PrefetchScalarGridSpec(
            num_scalar_prefetch=0,
            grid=(b, n_row_tiles),
            in_specs=[
                pl.BlockSpec((None, k0, tile), tile_map),     # uxt (streamed)
                pl.BlockSpec((None, h0p, k0), batch_map),     # per-batch layer-0 slab
                pl.BlockSpec(wslab.shape, const_map),         # packed weights
                pl.BlockSpec(bslab.shape, const_map),         # packed biases (f32)
            ],
            out_specs=pl.BlockSpec((None, tf, tile), tile_map),
        ),
        compiler_params=pltpu.CompilerParams(
            dimension_semantics=("parallel", "parallel"),
            vmem_limit_bytes=32 * 1024 * 1024),
    )(uxt, w0, wslab, bslab)

    return out_padded[:, :, :p].reshape(b, tf, nx, ny)


# -----------------------------------------------------------------------------
# Pure-numpy (float64) reference mirroring the PyTorch forward
# -----------------------------------------------------------------------------
def _reference_forward_np(params, u, grid, dt, variables, eq_variables, time_future):
    u = np.asarray(u, np.float64)
    grid = np.asarray(grid, np.float64)
    dt = np.asarray(dt, np.float64)
    b, tw, nx, ny = u.shape
    u_cl = np.transpose(u, (0, 2, 3, 1))
    dx = grid[:, 0, 0, 1] - grid[:, 0, 0, 0]
    dy = grid[:, 1, 1, 0] - grid[:, 1, 0, 0]

    def col(v):
        return np.broadcast_to(np.asarray(v, np.float64)[:, None, None, None],
                               (b, nx, ny, 1))

    feats = [u_cl, col(dx), col(dy),
             np.broadcast_to(dt.reshape(1, 1, 1, 1), (b, nx, ny, 1))]
    for name in ("nu", "ax", "ay", "cx", "cy"):
        if name in eq_variables:
            feats.append(col(np.asarray(variables[name], np.float64)
                             / eq_variables[name]))
    xb = np.concatenate(feats, axis=-1)
    xt = np.transpose(grid, (0, 2, 3, 1))

    def mlp(x, layers):
        for li, (w, bb) in enumerate(layers):
            x = x @ np.asarray(w, np.float64) + np.asarray(bb, np.float64)
            if li != len(layers) - 1:
                x = np.tanh(x)
        return x

    x_func = mlp(xb, params["branch"])
    x_loc = mlp(xt, params["trunk"])
    out = x_func * x_loc + np.asarray(params["b"], np.float64)
    return np.transpose(out, (0, 3, 1, 2))


# -----------------------------------------------------------------------------
if __name__ == "__main__":
    batch, nx, ny = 2, 16, 16
    time_window, time_future = 4, 2
    layer_sizes_branch = [32, 32]
    layer_sizes_trunk = [32, 32]
    eq_variables = {"nu": 1.0, "ax": 1.0, "ay": 1.0}   # branch input dim = 3 + 3 + 4 = 10

    key = jax.random.PRNGKey(0)
    kp, ku, kv = jax.random.split(key, 3)

    params = init_params(kp, layer_sizes_branch, layer_sizes_trunk,
                         time_window, time_future, eq_variables)

    u = jax.random.normal(ku, (batch, time_window, nx, ny), jnp.float32)
    xs = jnp.linspace(0.0, 1.0, ny)
    ys = jnp.linspace(0.0, 1.0, nx)
    gx = jnp.broadcast_to(xs[None, None, :], (batch, nx, ny))
    gy = jnp.broadcast_to(ys[None, :, None], (batch, nx, ny))
    grid = jnp.stack([gx, gy], axis=1)                 # [b, 2, nx, ny]
    dt = jnp.array([0.01], jnp.float32)
    kvn, kva, kvb = jax.random.split(kv, 3)
    variables = {
        "nu": jax.random.uniform(kvn, (batch,), jnp.float32, 0.1, 1.0),
        "ax": jax.random.uniform(kva, (batch,), jnp.float32, -1.0, 1.0),
        "ay": jax.random.uniform(kvb, (batch,), jnp.float32, -1.0, 1.0),
    }

    ref = _reference_forward_np(params, u, grid, dt, variables, eq_variables,
                                time_future)

    # f32 path (v5e-friendly: all VPU/EUP math and MXU operands in f32).
    out_f32 = deeponet2d_forward(params, u, grid, dt, variables, eq_variables,
                                 time_future, compute_dtype=jnp.float32)
    out_f32 = jax.block_until_ready(out_f32)
    assert out_f32.shape == (batch, time_future, nx, ny)
    assert np.allclose(np.asarray(out_f32), ref, atol=2e-2, rtol=2e-2)

    # bf16 streaming / bf16-resident activations (v6e / v7x oriented path).
    out_bf16 = deeponet2d_forward(params, u, grid, dt, variables, eq_variables,
                                  time_future, compute_dtype=jnp.bfloat16)
    out_bf16 = jax.block_until_ready(out_bf16)
    assert out_bf16.shape == (batch, time_future, nx, ny)
    assert np.allclose(np.asarray(out_bf16), ref, atol=1e-1, rtol=1e-1)

    print("KERNEL_OK")
</pallas_src>

<mosaic_0001>
module attributes {stable_mosaic.version = 11 : i64} {
  func.func @kernel(%arg0: i32, %arg1: i32, %arg2: memref<1x8x256xf32, #tpu.memory_space<vmem>>, %arg3: memref<1x64x8xf32, #tpu.memory_space<vmem>>, %arg4: memref<80x64xf32, #tpu.memory_space<vmem>>, %arg5: memref<88x1xf32, #tpu.memory_space<vmem>>, %arg6: memref<1x2x256xf32, #tpu.memory_space<vmem>>) attributes {dimension_semantics = [#tpu.dimension_semantics<parallel>, #tpu.dimension_semantics<parallel>], iteration_bounds = array<i64: 2, 1>, scalar_prefetch = 0 : i64, scratch_operands = 0 : i64, tpu.core_type = #tpu.core_type<tc>, window_params = [{transform_indices = @transform_0, window_bounds = array<i64: 1, 8, 256>}, {transform_indices = @transform_1, window_bounds = array<i64: 1, 64, 8>}, {pipeline_mode = #tpu.pipeline_mode<synchronous>, transform_indices = @transform_2, window_bounds = array<i64: 80, 64>}, {pipeline_mode = #tpu.pipeline_mode<synchronous>, transform_indices = @transform_3, window_bounds = array<i64: 88, 1>}, {transform_indices = @transform_4, window_bounds = array<i64: 1, 2, 256>}]} {
    %c0 = arith.constant 0 : index
    %c0_0 = arith.constant 0 : index
    %c0_1 = arith.constant 0 : index
    %0 = vector.load %arg3[%c0, %c0_0, %c0_1] : memref<1x64x8xf32, #tpu.memory_space<vmem>>, vector<1x64x8xf32>
    %1 = vector.shape_cast %0 : vector<1x64x8xf32> to vector<64x8xf32>
    %c0_2 = arith.constant 0 : index
    %c0_3 = arith.constant 0 : index
    %c0_4 = arith.constant 0 : index
    %2 = vector.load %arg2[%c0_2, %c0_3, %c0_4] : memref<1x8x256xf32, #tpu.memory_space<vmem>>, vector<1x8x256xf32>
    %3 = vector.shape_cast %2 : vector<1x8x256xf32> to vector<8x256xf32>
    %cst = arith.constant dense<0.000000e+00> : vector<64x256xf32>
    %4 = tpu.matmul %1, %3, %cst {dimension_numbers = #tpu.dot_dimension_numbers<[1], [0], [0], [1], [0, 0, 1, 1], [], []>} : vector<64x8xf32>, vector<8x256xf32>, vector<64x256xf32> -> vector<64x256xf32>
    %5 = math.tanh %4 : vector<64x256xf32>
    %c0_5 = arith.constant 0 : index
    %c0_6 = arith.constant 0 : index
    %6 = vector.load %arg4[%c0_5, %c0_6] : memref<80x64xf32, #tpu.memory_space<vmem>>, vector<64x64xf32>
    %cst_7 = arith.constant dense<0.000000e+00> : vector<64x256xf32>
    %7 = tpu.matmul %6, %5, %cst_7 {dimension_numbers = #tpu.dot_dimension_numbers<[1], [0], [0], [1], [0, 0, 1, 1], [], []>} : vector<64x64xf32>, vector<64x256xf32>, vector<64x256xf32> -> vector<64x256xf32>
    %c0_8 = arith.constant 0 : index
    %c0_9 = arith.constant 0 : index
    %8 = vector.load %arg5[%c0_8, %c0_9] : memref<88x1xf32, #tpu.memory_space<vmem>>, vector<64x1xf32>
    %9 = vector.broadcast %8 : vector<64x1xf32> to vector<64x256xf32>
    %10 = arith.addf %7, %9 : vector<64x256xf32>
    %11 = math.tanh %10 : vector<64x256xf32>
    %c64 = arith.constant 64 : index
    %c0_10 = arith.constant 0 : index
    %12 = vector.load %arg4[%c64, %c0_10] : memref<80x64xf32, #tpu.memory_space<vmem>>, vector<2x64xf32>
    %c72 = arith.constant 72 : index
    %c0_11 = arith.constant 0 : index
    %13 = vector.load %arg4[%c72, %c0_11] : memref<80x64xf32, #tpu.memory_space<vmem>>, vector<2x64xf32>
    %cst_12 = arith.constant dense<0.000000e+00> : vector<2x256xf32>
    %14 = tpu.matmul %12, %11, %cst_12 {dimension_numbers = #tpu.dot_dimension_numbers<[1], [0], [0], [1], [0, 0, 1, 1], [], []>} : vector<2x64xf32>, vector<64x256xf32>, vector<2x256xf32> -> vector<2x256xf32>
    %c64_13 = arith.constant 64 : index
    %c0_14 = arith.constant 0 : index
    %15 = vector.load %arg5[%c64_13, %c0_14] : memref<88x1xf32, #tpu.memory_space<vmem>>, vector<2x1xf32>
    %16 = vector.broadcast %15 : vector<2x1xf32> to vector<2x256xf32>
    %17 = arith.addf %14, %16 : vector<2x256xf32>
    %cst_15 = arith.constant dense<0.000000e+00> : vector<2x256xf32>
    %18 = tpu.matmul %13, %11, %cst_15 {dimension_numbers = #tpu.dot_dimension_numbers<[1], [0], [0], [1], [0, 0, 1, 1], [], []>} : vector<2x64xf32>, vector<64x256xf32>, vector<2x256xf32> -> vector<2x256xf32>
    %c72_16 = arith.constant 72 : index
    %c0_17 = arith.constant 0 : index
    %19 = vector.load %arg5[%c72_16, %c0_17] : memref<88x1xf32, #tpu.memory_space<vmem>>, vector<2x1xf32>
    %20 = vector.broadcast %19 : vector<2x1xf32> to vector<2x256xf32>
    %21 = arith.addf %18, %20 : vector<2x256xf32>
    %22 = arith.mulf %17, %21 : vector<2x256xf32>
    %c80 = arith.constant 80 : index
    %c0_18 = arith.constant 0 : index
    %23 = vector.load %arg5[%c80, %c0_18] : memref<88x1xf32, #tpu.memory_space<vmem>>, vector<2x1xf32>
    %24 = vector.broadcast %23 : vector<2x1xf32> to vector<2x256xf32>
    %25 = arith.addf %22, %24 : vector<2x256xf32>
    %c0_19 = arith.constant 0 : index
    %c0_20 = arith.constant 0 : index
    %c0_21 = arith.constant 0 : index
    %26 = vector.load %arg6[%c0_19, %c0_20, %c0_21] : memref<1x2x256xf32, #tpu.memory_space<vmem>>, vector<1x2x256xf32>
    %27 = vector.shape_cast %26 : vector<1x2x256xf32> to vector<2x256xf32>
    %28 = vector.shape_cast %25 : vector<2x256xf32> to vector<1x2x256xf32>
    tpu.vector_store %arg6[%c0_19, %c0_20, %c0_21], %28 {strides = array<i32>} : memref<1x2x256xf32, #tpu.memory_space<vmem>>, vector<1x2x256xf32>,
    return
  }
  func.func @transform_0(%arg0: i32, %arg1: i32) -> (i32, i32, i32) {
    %c0_i32 = arith.constant 0 : i32
    %c0_i32_0 = arith.constant 0 : i32
    return %arg0, %c0_i32, %arg1 : i32, i32, i32
  }
  func.func @transform_1(%arg0: i32, %arg1: i32) -> (i32, i32, i32) {
    %c0_i32 = arith.constant 0 : i32
    %c0_i32_0 = arith.constant 0 : i32
    %c0_i32_1 = arith.constant 0 : i32
    return %arg0, %c0_i32, %c0_i32_0 : i32, i32, i32
  }
  func.func @transform_2(%arg0: i32, %arg1: i32) -> (i32, i32) {
    %c0_i32 = arith.constant 0 : i32
    %c0_i32_0 = arith.constant 0 : i32
    %c0_i32_1 = arith.constant 0 : i32
    return %c0_i32, %c0_i32_0 : i32, i32
  }
  func.func @transform_3(%arg0: i32, %arg1: i32) -> (i32, i32) {
    %c0_i32 = arith.constant 0 : i32
    %c0_i32_0 = arith.constant 0 : i32
    %c0_i32_1 = arith.constant 0 : i32
    return %c0_i32, %c0_i32_0 : i32, i32
  }
  func.func @transform_4(%arg0: i32, %arg1: i32) -> (i32, i32, i32) {
    %c0_i32 = arith.constant 0 : i32
    %c0_i32_0 = arith.constant 0 : i32
    return %arg0, %c0_i32, %arg1 : i32, i32, i32
  }
}

</mosaic_0001>

<bundles_post_ra>
// kernel: tpu_custom_call.1
= control target key start
LH: loop header
LB: loop body
LE: loop exit
PB: predicated region body
PF: predicated region fallthrough
CT: control target
= control target key end

     0   :  { %9 = vsyncpa [#allocation3], 0  ;;  %s1440_s0 = inlined_call_operand.vmem [shape: f32[2,8,256], index: 0, kind: input, shape index: {}]   ;;  %s1441_s1 = inlined_call_operand.vmem [shape: f32[2,64,8], index: 1, kind: input, shape index: {}]   ;;  %s1442_s2 = inlined_call_operand.vmem [shape: f32[80,64], index: 2, kind: input, shape index: {}]   ;;  %s1443_s3 = inlined_call_operand.vmem [shape: f32[88,1], index: 3, kind: input, shape index: {}]   ;;  %s1444_s4 = inlined_call_operand.hbm [shape: f32[2,2,256], index: 4, kind: output, shape index: {}]  }
   0x1   :  { %11 = vsyncpa [#allocation3 + $0x1], 0  ;;  %s1226_s15 = smov 0   ;;  %s1228_s16 = smov 0  }
   0x2   :  { %s1230_s17 = smov 0   ;;  %s1232_s18 = smov 0  }
   0x3   :  { %s1234_s19 = smov 0   ;;  %s1236_s20 = smov 0  }
   0x4 LB: > { %s910_s21 = sadd.s32 4294967295, %s1196_s20   ;;  %s911_s22 = sadd.s32 4294967294, %s1196_s20   ;;  %s1196_s20 = sphi %s1236_s20, %s17_s20   ;;  %s1192_s19 = sphi %s1234_s19, %s1451_s19   ;;  %s1188_s18 = sphi %s1232_s18, %s1450_s18   ;;  %s1184_s17 = sphi %s1230_s17, %s1449_s17   ;;  %s1180_s16 = sphi %s1228_s16, %s1448_s16   ;;  %s1176_s15 = sphi %s1226_s15, %s1447_s15  }
   0x5   : > { %s29_s23 = sadd.s32 1, %s1192_s19  ;;  %s134_s24 = sadd.s32 1, %s1184_s17 }
   0x6   : > { %p31_p0 = scmp.ge.s32.totalorder %s29_s23, 2  ;;  %p144_p1 = scmp.ne.s32.totalorder %s1184_s17, %s1180_s16 }
   0x7   : > { %p145_p2 = scmp.eq.s32.totalorder %s910_s21, 1  ;;  %p150_p3 = scmp.ne.s32.totalorder %s1180_s16, %s1176_s15 }
   0x8   : > { %s1453_s23 = smov (%p31_p0, %s29_s23), 0  ;;  %p151_p5 = scmp.eq.s32.totalorder %s911_s22, 1 }
   0x9   : > { %p1266_p4 = por %p145_p2, %p144_p1  ;;  %s129_s26 = ssub.s32 %s1192_s19, %s1453_s23 }
   0xa   : > { %p914_p6 = scmp.ge.s32.totalorder %s1196_s20, 1  ;;  %p132_p7 = scmp.eq.s32.totalorder %s129_s26, 0 }
   0xb   : > { %p1273_p8 = por %p151_p5, %p150_p3  ;;  %p196_p9 = scmp.lt.s32.totalorder %s1196_s20, 3 }
   0xc   : > { %s1279_s28 = scalar_select %p132_p7, %s1184_s17, %s134_s24  }
   0xd   : > { %p197_p10 = pnand %p914_p6, %p196_p9 }
   0xe   : > { %p232_p11 = scmp.lt.s32.totalorder (!%p197_p10), %s1188_s18, 1  ;;  %v1198_v0 = vmov (!%p197_p10), 0.0   ;;  %vm257_vm0 = vcmask (!%p197_p10), 64512   ;;  %v419_v11 = vld [vmem:[%s1443_s3] sm:$0xff] (!%p197_p10)  ;;  %v1199_v12 = vmov (!%p197_p10), 0   ;;  %v421_v13 = vld [vmem:[%s1443_s3 + $0x10] sm:$0xff] (!%p197_p10) }
   0xf   : > { %200 = sbr.rel (%p197_p10) target bundleno = 782 (0x30e), region = 36  ;;  %346 = vmatprep.mubr.f32.mxu0 (!%p197_p10), %v1198_v0  ;;  %556 = vmatprep.mubr.f32.mxu1 (!%p197_p10), %v1198_v0  ;;  %v420_v14 = vld [vmem:[%s1443_s3 + $0x8] sm:$0xff] (!%p197_p10)  ;;  %v422_v15 = vld [vmem:[%s1443_s3 + $0x18] sm:$0xff] (!%p197_p10)  ;;  %v423_v16 = vld [vmem:[%s1443_s3 + $0x20] sm:$0xff] (!%p197_p10)  ;;  %vm467_vm1 = vcmask (!%p197_p10), 523264   ;;  %s228_s6 = sand.u32 (!%p197_p10), 1, %s1180_s16  }
  0x10   : > { %1052 = vset.pattern.permute.xlu0 (!%p197_p10), %v1199_v12  ;;  %1053 = vset.pattern.permute.xlu1 (!%p197_p10), %v1199_v12  ;;  %v424_v17 = vld [vmem:[%s1443_s3 + $0x28] sm:$0xff] (!%p197_p10)  ;;  %v425_v18 = vld [vmem:[%s1443_s3 + $0x30] sm:$0xff] (!%p197_p10)  ;;  %v426_v19 = vld [vmem:[%s1443_s3 + $0x38] sm:$0xff] (!%p197_p10)  ;;  %s915_s7 = sshll.u32 (!%p197_p10), %s228_s6, 2  ;;  %s806_s14 = scalar_lea.sflag (!%p197_p10), [#allocation3], %s228_s6 }
  0x11   : > { %429 = vperm.xlu0 (!%p197_p10), %1052, %v419_v11   ;;  %439 = vperm.xlu1 (!%p197_p10), %1053, %v421_v13   ;;  %v623_v20 = vld [vmem:[%s1443_s3 + $0x40] sm:$0x3] (!%p197_p10)  ;;  %v703_v21 = vld [vmem:[%s1443_s3 + $0x48] sm:$0x3] (!%p197_p10)  ;;  %v785_v22 = vld [vmem:[%s1443_s3 + $0x50] sm:$0x3] (!%p197_p10) }
  0x12   : > { %v411_v63 = vld [vmem:[%s1442_s2] sm:$0xff] (!%p197_p10)  ;;  %s230_s9 = scalar_lea.vmem (!%p197_p10), [#allocation2], %s915_s7 }
  0x13   : > { %s822_s10 = sshll.u32 (!%p197_p10), %s230_s9, 4  ;;  %s1395_s10 = int_to_ptr.vmem [resolvable:$true] %s822_s10 }
  0x14   : > { %s1118_s21 = scalar_lea.vmem (!%p197_p10), %s1395_s10, 64 }
  0x15   : > { %434 = vperm.xlu0 (!%p197_p10), %1052, %v420_v14   ;;  %444 = vperm.xlu1 (!%p197_p10), %1053, %v422_v15   ;;  %p1119_p12 = scmp.ne.s32.totalorder (!%p197_p10), %s1395_s10, %s1118_s21 }
  0x16   : > { %s233_s29 = scalar_select %p232_p11, %s1188_s18, 1 }
  0x17   : > { %p1120_p13 = pnand %p1119_p12, %p1266_p4 }
  0x18   : > { %s944_s30 = sshll.u32 %s233_s29, 4  ;;  %s945_s5 = sshll.u32 %s233_s29, 6 }
  0x19   : > { %s239_s8 = scalar_lea.vmem %s1440_s0, %s944_s30  ;;  %s245_s11 = scalar_lea.vmem %s1441_s1, %s945_s5  ;;  %449 = vperm.xlu0 %1052, %v423_v16   ;;  %454 = vperm.xlu1 %1053, %v424_v17  }
  0x1a   : > { %v256_v1 = vld [vmem:[%s239_s8 + $0x8] sm:$0xff]  ;;  %v255_v2 = vld [vmem:[%s239_s8] sm:$0xff]  ;;  %v249_v5 = vld [vmem:[%s245_s11 + $0x10] sm:$0xff]  ;;  %s946_s8 = sshll.u32 %s1188_s18, 6  ;;  %p1121_p0 = pneg %p1120_p13 }
  0x1b   : > { %v247_v3 = vld [vmem:[%s245_s11] sm:$0xff]  ;;  %282 = vmatprep.subr.mxu0 %v256_v1  ;;  %v248_v4 = vld [vmem:[%s245_s11 + $0x8] sm:$0xff]  ;;  %v250_v6 = vld [vmem:[%s245_s11 + $0x18] sm:$0xff]  ;;  %s1393_s13 = scalar_lea.hbm %s1444_s4, %s946_s8  ;;  %s1200_s18 = smov [#allocation2]  }
  0x1c   : > { %283 = vmatpush1.msra.mxu0 %v255_v2  ;;  %v251_v7 = vld [vmem:[%s245_s11 + $0x20] sm:$0xff]  ;;  %v252_v8 = vld [vmem:[%s245_s11 + $0x28] sm:$0xff]  ;;  %v253_v9 = vld [vmem:[%s245_s11 + $0x30] sm:$0xff]  ;;  %s1122_s22 = sshll.u32 %s1200_s18, 4  ;;  %s1123_s22 = int_to_ptr.vmem [resolvable:$false] %s1122_s22 }
  0x1d   : > { %920 = vmatmul.mubr.msk.f32.vlgmr.msra.gmra.mrb[0].mxu0 %vm257_vm0, %v247_v3  ;;  %v254_v10 = vld [vmem:[%s245_s11 + $0x38] sm:$0xff]  ;;  %459 = vperm.xlu0 %1052, %v425_v18   ;;  %v412_v1 = vld [vmem:[%s1442_s2 + $0x8] sm:$0xff]  ;;  %v413_v2 = vld [vmem:[%s1442_s2 + $0x10] sm:$0xff]  ;;  %s1124_s24 = scalar_lea.vmem %s1123_s22, 128  ;;  %p1125_p1 = scmp.lt.s32.totalorder %s1395_s10, %s1123_s22 }
  0x1e   : > { %352 = vmatprep.mubr.f32.mxu0 %v1198_v0  ;;  %464 = vperm.xlu1 %1053, %v426_v19   ;;  %v414_v3 = vld [vmem:[%s1442_s2 + $0x18] sm:$0xff]  ;;  %p1126_p2 = scmp.lt.s32.totalorder %s1124_s24, %s1118_s21 }
  0x20   : > { %p1127_p3 = por %p1126_p2, %p1125_p1 }
  0x21   : > { %921 = vmatmul.mubr.msk.f32.gmra.mrb[2].mxu0 %vm257_vm0, %v248_v4  ;;  %626 = vperm.xlu0 %1052, %v623_v20   ;;  %v415_v4 = vld [vmem:[%s1442_s2 + $0x20] sm:$0xff] }
  0x22   : > { %358 = vmatprep.mubr.f32.mxu0 %v1198_v0  ;;  %706 = vperm.xlu1 %1053, %v703_v21   ;;  %p1128_p5 = pnand %p1127_p3, %p1121_p0 }
  0x25   : > { %922 = vmatmul.mubr.msk.f32.gmra.mrb[4].mxu0 %vm257_vm0, %v249_v5  ;;  %788 = vperm.xlu0 %1052, %v785_v22   ;;  %v416_v5 = vld [vmem:[%s1442_s2 + $0x28] sm:$0xff] }
  0x26   : > { %364 = vmatprep.mubr.f32.mxu0 %v1198_v0 }
  0x29   : > { %923 = vmatmul.mubr.msk.f32.gmra.mrb[6].mxu0 %vm257_vm0, %v250_v6  ;;  %v417_v6 = vld [vmem:[%s1442_s2 + $0x30] sm:$0xff] }
  0x2a   : > { %370 = vmatprep.mubr.f32.mxu0 %v1198_v0 }
  0x2d   : > { %924 = vmatmul.mubr.msk.f32.gmra.mrb[8].mxu0 %vm257_vm0, %v251_v7  ;;  %v418_v7 = vld [vmem:[%s1442_s2 + $0x38] sm:$0xff] }
  0x2e   : > { %376 = vmatprep.mubr.f32.mxu0 %v1198_v0 }
  0x31   : > { %925 = vmatmul.mubr.msk.f32.gmra.mrb[10].mxu0 %vm257_vm0, %v252_v8 }
  0x32   : > { %382 = vmatprep.mubr.f32.mxu0 %v1198_v0 }
  0x35   : > { %926 = vmatmul.mubr.msk.f32.gmra.mrb[12].mxu0 %vm257_vm0, %v253_v9 }
  0x36   : > { %388 = vmatprep.mubr.f32.mxu0 %v1198_v0 }
  0x39   : > { %927 = vmatmul.mubr.msk.f32.gmra.mrb[14].mxu0 %vm257_vm0, %v254_v10 }
  0x3a   : > { %696 = vmatprep.mubr.f32.mxu0 %v1198_v0 }
  0x90   : > { %v430_v8 = vpop.permute.xlu0 %429  ;;  %v440_v17 = vpop.permute.xlu1 %439 }
  0x94   : > { %v435_v13 = vpop.permute.xlu0 %434 }
  0xf0   : > { %v348_v23 = vpop.f32.mrb[0].mxu0 }
  0xf1   : > { %v350_v24 = vpop.f32.mrb[1].mxu0  ;;  %1054 = vtanh.f32 %v348_v23 }
  0xf2   : > { %1056 = vtanh.f32 %v350_v24 }
  0xf4   : > { %v354_v25 = vpop.f32.mrb[2].mxu0 }
  0xf5   : > { %1058 = vtanh.f32 %v354_v25  ;;  %v356_v26 = vpop.f32.mrb[3].mxu0 }
  0xf6   : > { %1060 = vtanh.f32 %v356_v26 }
  0xf8   : > { %v360_v27 = vpop.f32.mrb[4].mxu0 }
  0xf9   : > { %v362_v28 = vpop.f32.mrb[5].mxu0  ;;  %1062 = vtanh.f32 %v360_v27 }
  0xfa   : > { %1064 = vtanh.f32 %v362_v28 }
  0xfb   : > { %v1055_v30 = vpop.eup %1054 }
  0xfc   : > { %v366_v29 = vpop.f32.mrb[6].mxu0  ;;  %v1057_v32 = vpop.eup %1056 }
  0xfd   : > { %1066 = vtanh.f32 %v366_v29  ;;  %v368_v31 = vpop.f32.mrb[7].mxu0  ;;  %v450_v29 = vpop.permute.xlu0 %449 }
  0xfe   : > { %1068 = vtanh.f32 %v368_v31 }
  0xff   : > { %v1059_v33 = vpop.eup %1058 }
 0x100   : > { %v1061_v34 = vpop.eup %1060  ;;  %v372_v35 = vpop.f32.mrb[8].mxu0  ;;  %v949_v36 = vpack.c.bf16 %v1059_v33, %v1055_v30 }
 0x101   : > { %v374_v37 = vpop.f32.mrb[9].mxu0  ;;  %v947_v38 = vpack.c.bf16 %v1061_v34, %v1057_v32  ;;  %1070 = vtanh.f32 %v372_v35 }
 0x102   : > { %1072 = vtanh.f32 %v374_v37 }
 0x103   : > { %948 = vmatprep.subr.bf16.mxu1 %v947_v38  ;;  %v1063_v40 = vpop.eup %1062 }
 0x104   : > { %v378_v39 = vpop.f32.mrb[10].mxu0  ;;  %950 = vmatpush1.bf16.msra.mxu1 %v949_v36  ;;  %v1065_v42 = vpop.eup %1064 }
 0x105   : > { %1074 = vtanh.f32 %v378_v39  ;;  %v380_v41 = vpop.f32.mrb[11].mxu0 }
 0x106   : > { %1076 = vtanh.f32 %v380_v41 }
 0x107   : > { %v1067_v43 = vpop.eup %1066 }
 0x108   : > { %v1069_v44 = vpop.eup %1068  ;;  %v384_v45 = vpop.f32.mrb[12].mxu0  ;;  %v953_v46 = vpack.c.bf16 %v1067_v43, %v1063_v40 }
 0x109   : > { %v386_v47 = vpop.f32.mrb[13].mxu0  ;;  %v951_v48 = vpack.c.bf16 %v1069_v44, %v1065_v42  ;;  %1078 = vtanh.f32 %v384_v45  ;;  %v460_v45 = vpop.permute.xlu0 %459 }
 0x10a   : > { %1080 = vtanh.f32 %v386_v47 }
 0x10b   : > { %952 = vmatprep.subr.bf16.mxu1 %v951_v48  ;;  %v1071_v50 = vpop.eup %1070 }
 0x10c   : > { %v390_v49 = vpop.f32.mrb[14].mxu0  ;;  %954 = vmatpush1.bf16.msra.mxu1 %v953_v46  ;;  %v1073_v52 = vpop.eup %1072 }
 0x10d   : > { %1082 = vtanh.f32 %v390_v49  ;;  %v392_v51 = vpop.f32.mrb[15].mxu0 }
 0x10e   : > { %1084 = vtanh.f32 %v392_v51 }
 0x10f   : > { %v1075_v53 = vpop.eup %1074 }
 0x110   : > { %v1077_v54 = vpop.eup %1076  ;;  %v957_v55 = vpack.c.bf16 %v1075_v53, %v1071_v50 }
 0x111   : > { %v955_v56 = vpack.c.bf16 %v1077_v54, %v1073_v52 }
 0x113   : > { %956 = vmatprep.subr.bf16.mxu1 %v955_v56  ;;  %v1079_v57 = vpop.eup %1078 }
 0x114   : > { %958 = vmatpush1.bf16.msra.mxu1 %v957_v55  ;;  %v1081_v58 = vpop.eup %1080 }
 0x117   : > { %v1083_v59 = vpop.eup %1082 }
 0x118   : > { %v1085_v60 = vpop.eup %1084  ;;  %v961_v61 = vpack.c.bf16 %v1083_v59, %v1079_v57 }
 0x119   : > { %v959_v62 = vpack.c.bf16 %v1085_v60, %v1081_v58 }
 0x11b   : > { %960 = vmatprep.subr.bf16.mxu1 %v959_v62 }
 0x11c   : > { %962 = vmatpush1.bf16.msra.mxu1 %v961_v61 }
 0x11f   : > { %928 = vmatmul.mubr.msk.f32.vlgmr.msra.gmra.mrb[0].mxu1 %vm467_vm1, %v411_v63 }
 0x120   : > { %562 = vmatprep.mubr.f32.mxu1 %v1198_v0 }
 0x123   : > { %929 = vmatmul.mubr.msk.f32.gmra.mrb[2].mxu1 %vm467_vm1, %v412_v1 }
 0x124   : > { %568 = vmatprep.mubr.f32.mxu1 %v1198_v0 }
 0x127   : > { %930 = vmatmul.mubr.msk.f32.gmra.mrb[4].mxu1 %vm467_vm1, %v413_v2 }
 0x128   : > { %574 = vmatprep.mubr.f32.mxu1 %v1198_v0 }
 0x12b   : > { %931 = vmatmul.mubr.msk.f32.gmra.mrb[6].mxu1 %vm467_vm1, %v414_v3 }
 0x12c   : > { %580 = vmatprep.mubr.f32.mxu1 %v1198_v0 }
 0x12f   : > { %932 = vmatmul.mubr.msk.f32.gmra.mrb[8].mxu1 %vm467_vm1, %v415_v4 }
 0x130   : > { %586 = vmatprep.mubr.f32.mxu1 %v1198_v0 }
 0x133   : > { %933 = vmatmul.mubr.msk.f32.gmra.mrb[10].mxu1 %vm467_vm1, %v416_v5 }
 0x134   : > { %592 = vmatprep.mubr.f32.mxu1 %v1198_v0 }
 0x137   : > { %934 = vmatmul.mubr.msk.f32.gmra.mrb[12].mxu1 %vm467_vm1, %v417_v6 }
 0x138   : > { %598 = vmatprep.mubr.f32.mxu1 %v1198_v0 }
 0x13b   : > { %935 = vmatmul.mubr.msk.f32.gmra.mrb[14].mxu1 %vm467_vm1, %v418_v7 }
 0x13c   : > { %776 = vmatprep.mubr.f32.mxu1 %v1198_v0  ;;  %v445_v0 = vpop.permute.xlu1 %444 }
 0x140   : > { %v455_v38 = vpop.permute.xlu1 %454 }
 0x144   : > { %v465_v54 = vpop.permute.xlu1 %464 }
 0x1f2   : > { %v558_v9 = vpop.f32.mrb[0].mxu1 }
 0x1f3   : > { %v559_v10 = vadd.f32 %v558_v9, %v430_v8  ;;  %v560_v11 = vpop.f32.mrb[1].mxu1  ;;  %v622_v9 = vld [vmem:[%s1442_s2 + $0x48] sm:$0x3] }
 0x1f4   : > { %v561_v12 = vadd.f32 %v560_v11, %v430_v8  ;;  %v621_v8 = vld [vmem:[%s1442_s2 + $0x40] sm:$0x3]  ;;  %v707_v11 = vpop.permute.xlu1 %706 }
 0x1f5   : > { %1086 = vtanh.f32 %v559_v10  ;;  %v627_v10 = vpop.permute.xlu0 %626 }
 0x1f6   : > { %v564_v14 = vpop.f32.mrb[2].mxu1  ;;  %1088 = vtanh.f32 %v561_v12 }
 0x1f7   : > { %v565_v15 = vadd.f32 %v564_v14, %v435_v13  ;;  %v566_v16 = vpop.f32.mrb[3].mxu1 }
 0x1f8   : > { %v567_v18 = vadd.f32 %v566_v16, %v435_v13 }
 0x1f9   : > { %1090 = vtanh.f32 %v565_v15 }
 0x1fa   : > { %1092 = vtanh.f32 %v567_v18  ;;  %v570_v19 = vpop.f32.mrb[4].mxu1 }
 0x1fb   : > { %v571_v20 = vadd.f32 %v570_v19, %v440_v17  ;;  %v572_v21 = vpop.f32.mrb[5].mxu1 }
 0x1fc   : > { %v573_v22 = vadd.f32 %v572_v21, %v440_v17  ;;  %v789_v21 = vpop.permute.xlu0 %788 }
 0x1fd   : > { %1094 = vtanh.f32 %v571_v20 }
 0x1fe   : > { %v576_v23 = vpop.f32.mrb[6].mxu1  ;;  %1096 = vtanh.f32 %v573_v22 }
 0x1ff   : > { %v577_v24 = vadd.f32 %v576_v23, %v445_v0  ;;  %v578_v25 = vpop.f32.mrb[7].mxu1  ;;  %v1087_v27 = vpop.eup %1086 }
 0x200   : > { %v579_v26 = vadd.f32 %v578_v25, %v445_v0  ;;  %v1089_v28 = vpop.eup %1088 }
 0x201   : > { %1098 = vtanh.f32 %v577_v24 }
 0x202   : > { %1100 = vtanh.f32 %v579_v26  ;;  %v582_v30 = vpop.f32.mrb[8].mxu1 }
 0x203   : > { %v1091_v31 = vpop.eup %1090  ;;  %v583_v32 = vadd.f32 %v582_v30, %v450_v29  ;;  %v584_v33 = vpop.f32.mrb[9].mxu1 }
 0x204   : > { %v1093_v34 = vpop.eup %1092  ;;  %v585_v35 = vadd.f32 %v584_v33, %v450_v29  ;;  %v965_v36 = vpack.c.bf16 %v1091_v31, %v1087_v27 }
 0x205   : > { %v963_v37 = vpack.c.bf16 %v1093_v34, %v1089_v28  ;;  %1102 = vtanh.f32 %v583_v32 }
 0x206   : > { %v588_v39 = vpop.f32.mrb[10].mxu1  ;;  %1104 = vtanh.f32 %v585_v35 }
 0x207   : > { %v589_v40 = vadd.f32 %v588_v39, %v455_v38  ;;  %v590_v41 = vpop.f32.mrb[11].mxu1  ;;  %964 = vmatprep.subr.bf16.mxu0 %v963_v37  ;;  %980 = vmatprep.subr.bf16.mxu1 %v963_v37  ;;  %v1095_v43 = vpop.eup %1094 }
 0x208   : > { %v591_v42 = vadd.f32 %v590_v41, %v455_v38  ;;  %966 = vmatpush1.bf16.msra.mxu0 %v965_v36  ;;  %982 = vmatpush1.bf16.msra.mxu1 %v965_v36  ;;  %v1097_v44 = vpop.eup %1096 }
 0x209   : > { %1106 = vtanh.f32 %v589_v40 }
 0x20a   : > { %1108 = vtanh.f32 %v591_v42  ;;  %v594_v46 = vpop.f32.mrb[12].mxu1 }
 0x20b   : > { %v1099_v47 = vpop.eup %1098  ;;  %v595_v48 = vadd.f32 %v594_v46, %v460_v45  ;;  %v596_v49 = vpop.f32.mrb[13].mxu1 }
 0x20c   : > { %v1101_v50 = vpop.eup %1100  ;;  %v597_v51 = vadd.f32 %v596_v49, %v460_v45  ;;  %v969_v52 = vpack.c.bf16 %v1099_v47, %v1095_v43 }
 0x20d   : > { %v967_v53 = vpack.c.bf16 %v1101_v50, %v1097_v44  ;;  %1110 = vtanh.f32 %v595_v48 }
 0x20e   : > { %v600_v55 = vpop.f32.mrb[14].mxu1  ;;  %1112 = vtanh.f32 %v597_v51 }
 0x20f   : > { %v601_v56 = vadd.f32 %v600_v55, %v465_v54  ;;  %v602_v57 = vpop.f32.mrb[15].mxu1  ;;  %968 = vmatprep.subr.bf16.mxu0 %v967_v53  ;;  %984 = vmatprep.subr.bf16.mxu1 %v967_v53  ;;  %v1103_v59 = vpop.eup %1102 }
 0x210   : > { %v603_v58 = vadd.f32 %v602_v57, %v465_v54  ;;  %970 = vmatpush1.bf16.msra.mxu0 %v969_v52  ;;  %986 = vmatpush1.bf16.msra.mxu1 %v969_v52  ;;  %v1105_v60 = vpop.eup %1104 }
 0x211   : > { %1114 = vtanh.f32 %v601_v56 }
 0x212   : > { %1116 = vtanh.f32 %v603_v58 }
 0x213   : > { %v1107_v61 = vpop.eup %1106 }
 0x214   : > { %v1109_v62 = vpop.eup %1108  ;;  %v973_v63 = vpack.c.bf16 %v1107_v61, %v1103_v59 }
 0x215   : > { %v971_v1 = vpack.c.bf16 %v1109_v62, %v1105_v60 }
 0x217   : > { %972 = vmatprep.subr.bf16.mxu0 %v971_v1  ;;  %988 = vmatprep.subr.bf16.mxu1 %v971_v1  ;;  %v1111_v2 = vpop.eup %1110 }
 0x218   : > { %974 = vmatpush1.bf16.msra.mxu0 %v973_v63  ;;  %990 = vmatpush1.bf16.msra.mxu1 %v973_v63  ;;  %v1113_v3 = vpop.eup %1112 }
 0x21b   : > { %v1115_v4 = vpop.eup %1114 }
 0x21c   : > { %v1117_v5 = vpop.eup %1116  ;;  %v977_v6 = vpack.c.bf16 %v1115_v4, %v1111_v2 }
 0x21d   : > { %v975_v7 = vpack.c.bf16 %v1117_v5, %v1113_v3 }
 0x21f   : > { %976 = vmatprep.subr.bf16.mxu0 %v975_v7  ;;  %992 = vmatprep.subr.bf16.mxu1 %v975_v7 }
 0x220   : > { %978 = vmatpush1.bf16.msra.mxu0 %v977_v6  ;;  %994 = vmatpush1.bf16.msra.mxu1 %v977_v6 }
 0x223   : > { %936 = vmatmul.mubr.msk.f32.vlgmr.msra.gmra.mrb[16].mxu0 %vm467_vm1, %v621_v8  ;;  %937 = vmatmul.mubr.msk.f32.vlgmr.msra.gmra.mrb[16].mxu1 %vm467_vm1, %v622_v9 }
 0x2f6   : > { %v698_v12 = vpop.f32.mrb[16].mxu0  ;;  %v778_v13 = vpop.f32.mrb[16].mxu1 }
 0x2f7   : > { %v699_v14 = vadd.f32 %v698_v12, %v627_v10  ;;  %v779_v15 = vadd.f32 %v778_v13, %v707_v11  ;;  %v700_v16 = vpop.f32.mrb[17].mxu0  ;;  %v780_v17 = vpop.f32.mrb[17].mxu1 }
 0x2f8   : > { %v701_v18 = vadd.f32 %v700_v16, %v627_v10  ;;  %v781_v19 = vadd.f32 %v780_v17, %v707_v11 }
 0x2f9   : > { %v783_v20 = vmul.f32 %v779_v15, %v699_v14 }
 0x2fa   : > { %v784_v22 = vmul.f32 %v781_v19, %v701_v18 }
 0x2fb   : > { %v791_v0 = vadd.f32 %v789_v21, %v783_v20 }
 0x2fc   : > { %v792_v23 = vadd.f32 %v789_v21, %v784_v22 }
 0x2fe   : > { %v795_v24 = vcombine.low %v791_v0, %v792_v23 }
 0x300   : > { %938 = vst.sshfl [vmem:[%s230_s9] sm:$0x33 pattern:$0x76325410] %v795_v24 }
 0x301   : > { %1131 = shalt.err (!%p1128_p5)
}
 0x302   : > { %s1132_s26 = scalar_lea.hbm %s1393_s13, 64  ;;  %s1136_s5 = scalar_lea.hbm %s1444_s4, 128 }
 0x303   : > { %p1133_p6 = scmp.ne.s32.totalorder %s1393_s13, %s1132_s26  ;;  %p1137_p10 = scmp.lt.u32.totalorder %s1393_s13, %s1444_s4 }
 0x304   : > { %p1138_p11 = scmp.lt.u32.totalorder %s1136_s5, %s1132_s26  ;;  %p1140_p13 = scmp.lt.u32.totalorder %s1132_s26, %s1393_s13 }
 0x305   : > { %p1134_p7 = pnand %p1133_p6, %p1266_p4 }
 0x306   : > { %p1139_p12 = por %p1138_p11, %p1137_p10 }
 0x307   : > { %p1135_p9 = pneg %p1134_p7 }
 0x308   : > { %p1141_p0 = por %p1140_p13, %p1139_p12 }
 0x30a   : > { %p1142_p1 = pnand %p1141_p0, %p1135_p9 }
 0x30c   : > { %1145 = shalt.err (!%p1142_p1)
}
 0x30d   : > { %995 = dma.vmem_to_hbm [thread:$0]  (%p1266_p4), %s1395_s10, 64, %s1393_s13, %s806_s14  }
 0x30e PF: > { %p1001_p2 = scmp.ge.s32.totalorder %s1196_s20, 2  ;;  %s834_s8 = sand.u32 1, %s1176_s15  }
 0x30f   : > { %s835_s9 = scalar_lea.sflag [#allocation3], %s834_s8 }
 0x310   : > { %p998_p3 = pnand %p1001_p2, %p1273_p8 }
 0x312   : > { %1171 = dma.done.wait (!%p998_p3), %s835_s9, 64  }
 0x313   : > { %1173 = vsyncadd (!%p998_p3), %s835_s9, 4294967232  ;;  %s17_s20 = sadd.s32 1, %s1196_s20   ;;  %s1447_s15 = smov %s1180_s16 }
 0x314   : > { %p14_p5 = scmp.ge.s32.totalorder %s17_s20, 4   ;;  %s1448_s16 = smov %s1184_s17 }
 0x315   : > { %s1449_s17 = smov %s1279_s28  ;;  %s1450_s18 = smov %s1192_s19 }
 0x316   : > { %s1451_s19 = smov %s1453_s23  ;;  %16 = sbr.rel (!%p14_p5) target bundleno = 4 (0x4), region = 74 }
 0x31d   :  { %840 = vsyncpa [#allocation3], 1 }
 0x31e   :  { %842 = vsyncpa [#allocation3 + $0x1], 1 }

</bundles_post_ra>
